<compile_context>
chip_gen: v7x
topology: tpu7x:2x2x1
jax: 0.10.0
libtpu: 0.0.40
codegen_flags: <defaults>
</compile_context>

<pallas_src>
import functools

import jax
import jax.numpy as jnp
import numpy as np
from jax.experimental import pallas as pl
from jax.experimental.pallas import tpu as pltpu


_HIDDEN = 64
_N_OUT = 3
_N_OUT_PAD = 8     # sublane-padded channel dim of the transposed last-layer weight


def _make_radiance_kernel(n_parts):
    """Build the MLP kernel for a fixed number of concatenated input parts."""

    def kernel(*refs):
        xs = refs[:n_parts]                               # each (tile, C_p)  f32
        w1s = refs[n_parts:2 * n_parts]                   # each (C_p, 64)    f32
        w2_ref, w3t_ref, o_ref = refs[2 * n_parts:2 * n_parts + 3]

        # Layer 1: concat fused into the matmul:  x @ W1 == sum_p x_p @ W1_p.
        h = None
        for x_ref, w1_ref in zip(xs, w1s):
            part = jnp.dot(x_ref[...], w1_ref[...],
                           preferred_element_type=jnp.float32)
            h = part if h is None else h + part
        h = jnp.maximum(h, 0.0)                           # ReLU (f32, v5e-safe)

        # Layer 2.
        h = jnp.dot(h, w2_ref[...], preferred_element_type=jnp.float32)
        h = jnp.maximum(h, 0.0)

        # Layer 3, channel-first: contract (8, 64) against (tile, 64) on the 64-dim
        # -> (8, tile).  Rows [0, 3) carry real weights, rows [3, 8) are zero pad.
        # No (tile, 128) padded logits and no large in-kernel transpose temporaries.
        logits_t = jax.lax.dot_general(
            w3t_ref[...], h,
            dimension_numbers=(((1,), (1,)), ((), ())),
            preferred_element_type=jnp.float32)           # (8, tile)

        x3 = logits_t[:_N_OUT, :]                         # (3, tile)
        # sigmoid = 1 / (1 + exp(-x)): exp on the EUP, cheap divide on 3 rows only.
        o_ref[...] = (1.0 / (1.0 + jnp.exp(-x3))).astype(o_ref.dtype)

    return kernel


@functools.partial(jax.jit, static_argnames=("tile_m",))
def _radiance_forward(parts, w1, w2, w3t, *, tile_m):
    """parts: tuple of (n, C_p) f32 arrays. Returns channel-first (3, n) f32."""
    n = parts[0].shape[0]
    dims = tuple(p.shape[1] for p in parts)
    n_parts = len(parts)
    hidden = w2.shape[0]
    d_in = sum(dims)

    # Split W1 per input part (fuses torch.cat into the first matmul).
    offs = np.cumsum((0,) + dims)
    w1_chunks = tuple(
        jax.lax.slice_in_dim(w1, int(offs[i]), int(offs[i + 1]), axis=0)
        for i in range(n_parts))

    # Row-tile selection:
    #  * big tiles amortize the ~0.35us/step grid overhead (dominant for this MLP),
    #  * keep >= ~8 grid steps for large n so both TCs / the pipeline have work,
    #  * never (much) larger than n.
    # Working set per row (double-buffered lane-padded narrow inputs + f32
    # intermediates) is ~2-3 KiB, so tile=8192 stays well under the 48 MiB VMEM
    # limit requested below (which itself fits v7x's 64 MiB physical VMEM and is
    # above v5e's 16 MiB default scoped limit).
    cap = 128 * pl.cdiv(n, 128)
    target = 256 * pl.cdiv(pl.cdiv(n, 8), 256)
    tile = max(128, min(tile_m, target, cap))
    grid = (pl.cdiv(n, tile),)

    in_specs = (
        [pl.BlockSpec((tile, c), lambda i: (i, 0)) for c in dims]        # x parts
        + [pl.BlockSpec((c, hidden), lambda i: (0, 0)) for c in dims]    # W1 chunks
        + [pl.BlockSpec((hidden, hidden), lambda i: (0, 0)),             # W2
           pl.BlockSpec((_N_OUT_PAD, hidden), lambda i: (0, 0))]         # W3^T (row-padded)
    )

    cost = pl.CostEstimate(
        flops=2 * n * (d_in * hidden + hidden * hidden + hidden * _N_OUT),
        transcendentals=_N_OUT * n,
        bytes_accessed=n * (4 * d_in + 4 * _N_OUT),
    )

    out_t = pl.pallas_call(
        _make_radiance_kernel(n_parts),
        out_shape=jax.ShapeDtypeStruct((_N_OUT, n), jnp.float32),
        grid_spec=pltpu.PrefetchScalarGridSpec(
            num_scalar_prefetch=0,
            grid=grid,
            in_specs=in_specs,
            out_specs=pl.BlockSpec((_N_OUT, tile), lambda i: (0, i)),
        ),
        compiler_params=pltpu.CompilerParams(
            dimension_semantics=("parallel",),
            vmem_limit_bytes=48 * 1024 * 1024),
        cost_estimate=cost,
    )(*parts, *w1_chunks, w2, w3t)

    return out_t                                        # (3, n) channel-first


class VolumeRadiancePallas:
    """JAX/Pallas re-implementation of VolumeRadiance.forward.

    # TODO(synk): only mlp_network_config = VanillaMLP(64 neurons, 2 hidden, bias-free)
    # with color_activation='sigmoid' is implemented (the config used by instant-nsr).
    """

    HIDDEN = _HIDDEN
    N_OUTPUT_DIMS = _N_OUT

    def __init__(self, n_input_dims, key):
        k1, k2, k3 = jax.random.split(key, 3)
        # Bias-free linears (VanillaMLP make_linear uses bias=False); kaiming-ish init.
        self.w1 = (jax.random.normal(k1, (n_input_dims, self.HIDDEN), jnp.float32)
                   * (2.0 / n_input_dims) ** 0.5)
        self.w2 = (jax.random.normal(k2, (self.HIDDEN, self.HIDDEN), jnp.float32)
                   * (2.0 / self.HIDDEN) ** 0.5)
        w3 = (jax.random.normal(k3, (self.HIDDEN, self.N_OUTPUT_DIMS), jnp.float32)
              * (2.0 / self.HIDDEN) ** 0.5)
        # Last layer stored transposed + row-padded to 8 -> channel-first kernel output.
        self.w3t = (jnp.zeros((_N_OUT_PAD, self.HIDDEN), jnp.float32)
                    .at[:self.N_OUTPUT_DIMS, :].set(w3.T))
        self.n_input_dims = n_input_dims

    def __call__(self, features, dirs, *args, tile_m=8192):
        # dirs intentionally unused (matches the reference forward).
        parts = tuple([features.reshape(-1, features.shape[-1])]
                      + [a.reshape(-1, a.shape[-1]) for a in args])
        assert sum(p.shape[1] for p in parts) == self.n_input_dims
        color_t = _radiance_forward(parts, self.w1, self.w2, self.w3t, tile_m=tile_m)
        # Consumers that can accept channel-first data should use (3, n) `color_t`
        # directly; the transpose below only exists to preserve the module's (..., 3)
        # output contract.
        return (color_t.T
                .reshape(*features.shape[:-1], self.N_OUTPUT_DIMS)
                .astype(jnp.float32))


def _reference(model, features, dirs, *args):
    """Pure-JAX f32 reference of the same forward."""
    parts = [features.reshape(-1, features.shape[-1])]
    parts += [a.reshape(-1, a.shape[-1]) for a in args]
    x = jnp.concatenate(parts, axis=-1).astype(jnp.float32)
    hp = jax.lax.Precision.HIGHEST
    w3 = model.w3t[:model.N_OUTPUT_DIMS, :].T
    h = jnp.maximum(jnp.dot(x, model.w1, precision=hp), 0.0)
    h = jnp.maximum(jnp.dot(h, model.w2, precision=hp), 0.0)
    out = jax.nn.sigmoid(jnp.dot(h, w3, precision=hp))
    return out.reshape(*features.shape[:-1], model.N_OUTPUT_DIMS)


if __name__ == "__main__":
    key = jax.random.PRNGKey(0)
    k_feat, k_dirs, k_arg, k_model, k_feat2, k_arg2 = jax.random.split(key, 6)

    # Small shapes: 2 rays x 64 samples (N = 128 rows), feature dim 8, one extra arg
    # of dim 8 -> n_input_dims (config.input_feature_dim) = 16.
    features = jax.random.normal(k_feat, (2, 64, 8), jnp.float32)
    dirs = jax.random.normal(k_dirs, (2, 64, 3), jnp.float32)   # unused by forward
    extra = jax.random.normal(k_arg, (2, 64, 8), jnp.float32)

    model = VolumeRadiancePallas(n_input_dims=16, key=k_model)

    color = model(features, dirs, extra)
    color = jax.block_until_ready(color)
    ref = _reference(model, features, dirs, extra)
    assert color.shape == (2, 64, 3), color.shape
    assert color.dtype == jnp.float32
    assert bool(jnp.all(jnp.isfinite(color)))
    assert jnp.allclose(color, ref, atol=2e-3, rtol=0.0), "mismatch vs reference (case 1)"

    # Ragged / multi-step grid case: N = 210 rows with tile_m=128 -> tile=128,
    # grid of 2 steps, last block partially out of bounds (masked on writeback).
    features2 = jax.random.normal(k_feat2, (3, 70, 8), jnp.float32)
    dirs2 = jnp.zeros((3, 70, 3), jnp.float32)
    extra2 = jax.random.normal(k_arg2, (3, 70, 8), jnp.float32)

    color2 = model(features2, dirs2, extra2, tile_m=128)
    color2 = jax.block_until_ready(color2)
    ref2 = _reference(model, features2, dirs2, extra2)
    assert color2.shape == (3, 70, 3), color2.shape
    assert bool(jnp.all(jnp.isfinite(color2)))
    assert jnp.allclose(color2, ref2, atol=2e-3, rtol=0.0), "mismatch vs reference (case 2)"

    print("KERNEL_OK")
</pallas_src>

<mosaic_0001>
module attributes {stable_mosaic.version = 11 : i64} {
  func.func @kernel(%arg0: i32, %arg1: memref<128x8xf32, #tpu.memory_space<vmem>>, %arg2: memref<128x8xf32, #tpu.memory_space<vmem>>, %arg3: memref<8x64xf32, #tpu.memory_space<vmem>>, %arg4: memref<8x64xf32, #tpu.memory_space<vmem>>, %arg5: memref<64x64xf32, #tpu.memory_space<vmem>>, %arg6: memref<8x64xf32, #tpu.memory_space<vmem>>, %arg7: memref<3x128xf32, #tpu.memory_space<vmem>>) attributes {dimension_semantics = [#tpu.dimension_semantics<parallel>], iteration_bounds = array<i64: 1>, scalar_prefetch = 0 : i64, scratch_operands = 0 : i64, tpu.core_type = #tpu.core_type<tc>, window_params = [{transform_indices = @transform_0, window_bounds = array<i64: 128, 8>}, {transform_indices = @transform_1, window_bounds = array<i64: 128, 8>}, {pipeline_mode = #tpu.pipeline_mode<synchronous>, transform_indices = @transform_2, window_bounds = array<i64: 8, 64>}, {pipeline_mode = #tpu.pipeline_mode<synchronous>, transform_indices = @transform_3, window_bounds = array<i64: 8, 64>}, {pipeline_mode = #tpu.pipeline_mode<synchronous>, transform_indices = @transform_4, window_bounds = array<i64: 64, 64>}, {pipeline_mode = #tpu.pipeline_mode<synchronous>, transform_indices = @transform_5, window_bounds = array<i64: 8, 64>}, {transform_indices = @transform_6, window_bounds = array<i64: 3, 128>}]} {
    %c0 = arith.constant 0 : index
    %c0_0 = arith.constant 0 : index
    %0 = vector.load %arg1[%c0, %c0_0] : memref<128x8xf32, #tpu.memory_space<vmem>>, vector<128x8xf32>
    %c0_1 = arith.constant 0 : index
    %c0_2 = arith.constant 0 : index
    %1 = vector.load %arg3[%c0_1, %c0_2] : memref<8x64xf32, #tpu.memory_space<vmem>>, vector<8x64xf32>
    %cst = arith.constant dense<0.000000e+00> : vector<128x64xf32>
    %2 = tpu.matmul %0, %1, %cst {dimension_numbers = #tpu.dot_dimension_numbers<[1], [0], [0], [1], [0, 0, 1, 1], [], []>} : vector<128x8xf32>, vector<8x64xf32>, vector<128x64xf32> -> vector<128x64xf32>
    %c0_3 = arith.constant 0 : index
    %c0_4 = arith.constant 0 : index
    %3 = vector.load %arg2[%c0_3, %c0_4] : memref<128x8xf32, #tpu.memory_space<vmem>>, vector<128x8xf32>
    %c0_5 = arith.constant 0 : index
    %c0_6 = arith.constant 0 : index
    %4 = vector.load %arg4[%c0_5, %c0_6] : memref<8x64xf32, #tpu.memory_space<vmem>>, vector<8x64xf32>
    %cst_7 = arith.constant dense<0.000000e+00> : vector<128x64xf32>
    %5 = tpu.matmul %3, %4, %cst_7 {dimension_numbers = #tpu.dot_dimension_numbers<[1], [0], [0], [1], [0, 0, 1, 1], [], []>} : vector<128x8xf32>, vector<8x64xf32>, vector<128x64xf32> -> vector<128x64xf32>
    %6 = arith.addf %2, %5 : vector<128x64xf32>
    %cst_8 = arith.constant 0.000000e+00 : f32
    %7 = vector.broadcast %cst_8 : f32 to vector<128x64xf32>
    %8 = arith.maximumf %6, %7 : vector<128x64xf32>
    %c0_9 = arith.constant 0 : index
    %c0_10 = arith.constant 0 : index
    %9 = vector.load %arg5[%c0_9, %c0_10] : memref<64x64xf32, #tpu.memory_space<vmem>>, vector<64x64xf32>
    %cst_11 = arith.constant dense<0.000000e+00> : vector<128x64xf32>
    %10 = tpu.matmul %8, %9, %cst_11 {dimension_numbers = #tpu.dot_dimension_numbers<[1], [0], [0], [1], [0, 0, 1, 1], [], []>} : vector<128x64xf32>, vector<64x64xf32>, vector<128x64xf32> -> vector<128x64xf32>
    %cst_12 = arith.constant 0.000000e+00 : f32
    %11 = vector.broadcast %cst_12 : f32 to vector<128x64xf32>
    %12 = arith.maximumf %10, %11 : vector<128x64xf32>
    %c0_13 = arith.constant 0 : index
    %c0_14 = arith.constant 0 : index
    %13 = vector.load %arg6[%c0_13, %c0_14] : memref<8x64xf32, #tpu.memory_space<vmem>>, vector<8x64xf32>
    %cst_15 = arith.constant dense<0.000000e+00> : vector<8x128xf32>
    %14 = tpu.matmul %13, %12, %cst_15 {dimension_numbers = #tpu.dot_dimension_numbers<[1], [1], [0], [0], [0, 0, 1, 0], [], []>} : vector<8x64xf32>, vector<128x64xf32>, vector<8x128xf32> -> vector<8x128xf32>
    %15 = vector.extract_strided_slice %14 {offsets = [0, 0], sizes = [3, 128], strides = [1, 1]} : vector<8x128xf32> to vector<3x128xf32>
    %cst_16 = arith.constant 0.000000e+00 : f32
    %16 = vector.broadcast %cst_16 : f32 to vector<3x128xf32>
    %17 = arith.subf %16, %15 : vector<3x128xf32>
    %18 = math.exp %17 : vector<3x128xf32>
    %cst_17 = arith.constant 1.000000e+00 : f32
    %19 = vector.broadcast %cst_17 : f32 to vector<3x128xf32>
    %20 = arith.addf %19, %18 : vector<3x128xf32>
    %cst_18 = arith.constant 1.000000e+00 : f32
    %21 = vector.broadcast %cst_18 : f32 to vector<3x128xf32>
    %22 = arith.divf %21, %20 : vector<3x128xf32>
    %c0_19 = arith.constant 0 : index
    %c0_20 = arith.constant 0 : index
    %23 = vector.load %arg7[%c0_19, %c0_20] : memref<3x128xf32, #tpu.memory_space<vmem>>, vector<3x128xf32>
    tpu.vector_store %arg7[%c0_19, %c0_20], %22 {strides = array<i32>} : memref<3x128xf32, #tpu.memory_space<vmem>>, vector<3x128xf32>,
    return
  }
  func.func @transform_0(%arg0: i32) -> (i32, i32) {
    %c0_i32 = arith.constant 0 : i32
    %c0_i32_0 = arith.constant 0 : i32
    return %arg0, %c0_i32 : i32, i32
  }
  func.func @transform_1(%arg0: i32) -> (i32, i32) {
    %c0_i32 = arith.constant 0 : i32
    %c0_i32_0 = arith.constant 0 : i32
    return %arg0, %c0_i32 : i32, i32
  }
  func.func @transform_2(%arg0: i32) -> (i32, i32) {
    %c0_i32 = arith.constant 0 : i32
    %c0_i32_0 = arith.constant 0 : i32
    %c0_i32_1 = arith.constant 0 : i32
    return %c0_i32, %c0_i32_0 : i32, i32
  }
  func.func @transform_3(%arg0: i32) -> (i32, i32) {
    %c0_i32 = arith.constant 0 : i32
    %c0_i32_0 = arith.constant 0 : i32
    %c0_i32_1 = arith.constant 0 : i32
    return %c0_i32, %c0_i32_0 : i32, i32
  }
  func.func @transform_4(%arg0: i32) -> (i32, i32) {
    %c0_i32 = arith.constant 0 : i32
    %c0_i32_0 = arith.constant 0 : i32
    %c0_i32_1 = arith.constant 0 : i32
    return %c0_i32, %c0_i32_0 : i32, i32
  }
  func.func @transform_5(%arg0: i32) -> (i32, i32) {
    %c0_i32 = arith.constant 0 : i32
    %c0_i32_0 = arith.constant 0 : i32
    %c0_i32_1 = arith.constant 0 : i32
    return %c0_i32, %c0_i32_0 : i32, i32
  }
  func.func @transform_6(%arg0: i32) -> (i32, i32) {
    %c0_i32 = arith.constant 0 : i32
    %c0_i32_0 = arith.constant 0 : i32
    return %c0_i32, %arg0 : i32, i32
  }
}

</mosaic_0001>

<bundles_post_ra>
// kernel: _radiance_forward.1
= control target key start
LH: loop header
LB: loop body
LE: loop exit
PB: predicated region body
PF: predicated region fallthrough
CT: control target
= control target key end

     0   :  { %vm58_vm0 = vcmask 64512   ;;  %s1436_s0 = inlined_call_operand.vmem [shape: f32[128,8], index: 0, kind: input, shape index: {}]   ;;  %s1437_s1 = inlined_call_operand.vmem [shape: f32[128,8], index: 1, kind: input, shape index: {}]   ;;  %s1438_s2 = inlined_call_operand.vmem [shape: f32[8,64], index: 2, kind: input, shape index: {}]   ;;  %s1439_s3 = inlined_call_operand.vmem [shape: f32[8,64], index: 3, kind: input, shape index: {}]   ;;  %s1440_s4 = inlined_call_operand.vmem [shape: f32[64,64], index: 4, kind: input, shape index: {}]   ;;  %s1441_s5 = inlined_call_operand.vmem [shape: f32[8,64], index: 5, kind: input, shape index: {}]   ;;  %s1442_s6 = inlined_call_operand.hbm [shape: f32[3,128], index: 6, kind: output, shape index: {}]  }
   0x1   :  { %v57_v0 = vld [vmem:[%s1439_s3] sm:$0xff]  ;;  %v42_v2 = vld [vmem:[%s1437_s1 + $0x8] sm:$0xff]  ;;  %v43_v4 = vld [vmem:[%s1437_s1 + $0x10] sm:$0xff] }
   0x2   :  { %v41_v1 = vld [vmem:[%s1437_s1] sm:$0xff]  ;;  %962 = vmatprep.subr.mxu0 %v57_v0  ;;  %v44_v5 = vld [vmem:[%s1437_s1 + $0x18] sm:$0xff]  ;;  %v46_v7 = vld [vmem:[%s1437_s1 + $0x28] sm:$0xff] }
   0x3   :  { %964 = vmatprep.mubr.msk.f32.mxu0 %vm58_vm0, %v41_v1  ;;  %v40_v3 = vld [vmem:[%s1438_s2] sm:$0xff]  ;;  %963 = vmatpush3.msra.mxu0 %v57_v0  ;;  %v47_v8 = vld [vmem:[%s1437_s1 + $0x30] sm:$0xff]  ;;  %v48_v9 = vld [vmem:[%s1437_s1 + $0x38] sm:$0xff] }
   0x4   :  { %965 = vmatmul.mubr.msk.f32.vlgmr.msra.gmra.mrb[0].mxu0 %vm58_vm0, %v42_v2  ;;  %988 = vmatprep.subr.mxu0 %v40_v3  ;;  %v45_v6 = vld [vmem:[%s1437_s1 + $0x20] sm:$0xff]  ;;  %v462_v11 = vld [vmem:[%s1440_s4 + $0x8] sm:$0xff]  ;;  %v463_v14 = vld [vmem:[%s1440_s4 + $0x10] sm:$0xff] }
   0x5   :  { %989 = vmatpush3.msra.mxu0 %v40_v3  ;;  %967 = vmatprep.mubr.msk.f32.mxu0 %vm58_vm0, %v43_v4  ;;  %v461_v10 = vld [vmem:[%s1440_s4] sm:$0xff]  ;;  %v464_v15 = vld [vmem:[%s1440_s4 + $0x18] sm:$0xff]  ;;  %v466_v18 = vld [vmem:[%s1440_s4 + $0x28] sm:$0xff] }
   0x6   :  { %v49_v12 = vld [vmem:[%s1437_s1 + $0x40] sm:$0xff]  ;;  %v1089_v13 = vpack.c.bf16 %v462_v11, %v461_v10  ;;  %v1093_v16 = vpack.c.bf16 %v464_v15, %v463_v14 }
   0x7   :  { %v465_v17 = vld [vmem:[%s1440_s4 + $0x20] sm:$0xff] }
   0x8   :  { %968 = vmatmul.mubr.msk.f32.gmra.mrb[2].mxu0 %vm58_vm0, %v44_v5 }
   0x9   :  { %970 = vmatprep.mubr.msk.f32.mxu0 %vm58_vm0, %v45_v6 }
   0xc   :  { %971 = vmatmul.mubr.msk.f32.gmra.mrb[4].mxu0 %vm58_vm0, %v46_v7 }
   0xd   :  { %973 = vmatprep.mubr.msk.f32.mxu0 %vm58_vm0, %v47_v8 }
   0xe   :  { %11 = vsyncpa [#allocation3], 0  ;;  %1090 = vmatprep.subr.bf16.mxu1 %v1089_v13  ;;  %v50_v19 = vld [vmem:[%s1437_s1 + $0x48] sm:$0xff]  ;;  %v1097_v20 = vpack.c.bf16 %v466_v18, %v465_v17  ;;  %v51_v21 = vld [vmem:[%s1437_s1 + $0x50] sm:$0xff]  ;;  %vm469_vm1 = vcmask 523264   ;;  %v1185_v14 = vmov 0.0|0.0  }
   0xf   :  { %1092 = vmatpush3.bf16.msra.mxu1 %v1089_v13  ;;  %v52_v22 = vld [vmem:[%s1437_s1 + $0x58] sm:$0xff]  ;;  %v53_v23 = vld [vmem:[%s1437_s1 + $0x60] sm:$0xff]  ;;  %v54_v24 = vld [vmem:[%s1437_s1 + $0x68] sm:$0xff]  ;;  %vm1186_vm2 = vmmov 0   ;;  %v1187_v15 = vmov 0.0   ;;  %s1188_s25 = smov [#allocation2]  }
  0x10   :  { %974 = vmatmul.mubr.msk.f32.gmra.mrb[6].mxu0 %vm58_vm0, %v48_v9  ;;  %1094 = vmatprep.subr.bf16.mxu1 %v1093_v16  ;;  %v55_v25 = vld [vmem:[%s1437_s1 + $0x70] sm:$0xff]  ;;  %v56_v26 = vld [vmem:[%s1437_s1 + $0x78] sm:$0xff]  ;;  %v24_v27 = vld [vmem:[%s1436_s0] sm:$0xff]  ;;  %s814_s26 = sshll.u32 %s1188_s25, 4  ;;  %s815_s26 = int_to_ptr.vmem [resolvable:$true] %s814_s26 }
  0x11   :  { %976 = vmatprep.mubr.msk.f32.mxu0 %vm58_vm0, %v49_v12  ;;  %v25_v28 = vld [vmem:[%s1436_s0 + $0x8] sm:$0xff]  ;;  %v26_v29 = vld [vmem:[%s1436_s0 + $0x10] sm:$0xff]  ;;  %v27_v30 = vld [vmem:[%s1436_s0 + $0x18] sm:$0xff]  ;;  %s1161_s27 = scalar_lea.vmem %s815_s26, 64  ;;  %p1166_p1 = scmp.lt.s32.totalorder %s815_s26, %s815_s26 }
  0x12   :  { %v28_v31 = vld [vmem:[%s1436_s0 + $0x20] sm:$0xff]  ;;  %v29_v32 = vld [vmem:[%s1436_s0 + $0x28] sm:$0xff]  ;;  %v30_v33 = vld [vmem:[%s1436_s0 + $0x30] sm:$0xff]  ;;  %p1162_p0 = scmp.ne.s32.totalorder %s815_s26, %s1161_s27  ;;  %p1167_p2 = scmp.lt.s32.totalorder %s1161_s27, %s1161_s27 }
  0x13   :  { %1096 = vmatpush3.bf16.msra.mxu1 %v1093_v16  ;;  %v31_v34 = vld [vmem:[%s1436_s0 + $0x38] sm:$0xff]  ;;  %v32_v35 = vld [vmem:[%s1436_s0 + $0x40] sm:$0xff]  ;;  %v33_v36 = vld [vmem:[%s1436_s0 + $0x48] sm:$0xff] }
  0x14   :  { %977 = vmatmul.mubr.msk.f32.gmra.mrb[8].mxu0 %vm58_vm0, %v50_v19  ;;  %1098 = vmatprep.subr.bf16.mxu1 %v1097_v20  ;;  %v34_v37 = vld [vmem:[%s1436_s0 + $0x50] sm:$0xff]  ;;  %v35_v38 = vld [vmem:[%s1436_s0 + $0x58] sm:$0xff]  ;;  %v36_v39 = vld [vmem:[%s1436_s0 + $0x60] sm:$0xff]  ;;  %p1168_p3 = por %p1167_p2, %p1166_p1 }
  0x15   :  { %979 = vmatprep.mubr.msk.f32.mxu0 %vm58_vm0, %v51_v21  ;;  %v37_v40 = vld [vmem:[%s1436_s0 + $0x68] sm:$0xff]  ;;  %v38_v41 = vld [vmem:[%s1436_s0 + $0x70] sm:$0xff]  ;;  %v39_v42 = vld [vmem:[%s1436_s0 + $0x78] sm:$0xff] }
  0x16   :  { %v467_v43 = vld [vmem:[%s1440_s4 + $0x30] sm:$0xff]  ;;  %v468_v44 = vld [vmem:[%s1440_s4 + $0x38] sm:$0xff]  ;;  %vm1400_vm3 = vmpackc.low %vm469_vm1, %vm469_vm1  ;;  %p1169_p4 = pnand %p1168_p3, %p1162_p0 }
  0x17   :  { %1100 = vmatpush3.bf16.msra.mxu1 %v1097_v20  ;;  %v1101_v45 = vpack.c.bf16 %v468_v44, %v467_v43 }
  0x18   :  { %980 = vmatmul.mubr.msk.f32.gmra.mrb[10].mxu0 %vm58_vm0, %v52_v22 }
  0x19   :  { %982 = vmatprep.mubr.msk.f32.mxu0 %vm58_vm0, %v53_v23  ;;  %1102 = vmatprep.subr.bf16.mxu1 %v1101_v45 }
  0x1b   :  { %1104 = vmatpush3.bf16.msra.mxu1 %v1101_v45 }
  0x1c   :  { %983 = vmatmul.mubr.msk.f32.gmra.mrb[12].mxu0 %vm58_vm0, %v54_v24  ;;  %1105 = vmatprep.subr.bf16.mxu1 %v1185_v14 }
  0x1d   :  { %985 = vmatprep.mubr.msk.f32.mxu0 %vm58_vm0, %v55_v25 }
  0x20   :  { %986 = vmatmul.mubr.msk.f32.gmra.mrb[14].mxu0 %vm58_vm0, %v56_v26 }
  0x21   :  { %990 = vmatprep.mubr.msk.f32.mxu0 %vm58_vm0, %v24_v27 }
  0x24   :  { %991 = vmatmul.mubr.msk.f32.vlgmr.msra.gmra.mrb[0].mxu0 %vm58_vm0, %v25_v28 }
  0x25   :  { %993 = vmatprep.mubr.msk.f32.mxu0 %vm58_vm0, %v26_v29 }
  0x28   :  { %994 = vmatmul.mubr.msk.f32.gmra.mrb[2].mxu0 %vm58_vm0, %v27_v30 }
  0x29   :  { %996 = vmatprep.mubr.msk.f32.mxu0 %vm58_vm0, %v28_v31 }
  0x2c   :  { %997 = vmatmul.mubr.msk.f32.gmra.mrb[4].mxu0 %vm58_vm0, %v29_v32 }
  0x2d   :  { %999 = vmatprep.mubr.msk.f32.mxu0 %vm58_vm0, %v30_v33 }
  0x30   :  { %1000 = vmatmul.mubr.msk.f32.gmra.mrb[6].mxu0 %vm58_vm0, %v31_v34 }
  0x31   :  { %1002 = vmatprep.mubr.msk.f32.mxu0 %vm58_vm0, %v32_v35 }
  0x34   :  { %1003 = vmatmul.mubr.msk.f32.gmra.mrb[8].mxu0 %vm58_vm0, %v33_v36 }
  0x35   :  { %1005 = vmatprep.mubr.msk.f32.mxu0 %vm58_vm0, %v34_v37 }
  0x38   :  { %1006 = vmatmul.mubr.msk.f32.gmra.mrb[10].mxu0 %vm58_vm0, %v35_v38 }
  0x39   :  { %1008 = vmatprep.mubr.msk.f32.mxu0 %vm58_vm0, %v36_v39 }
  0x3c   :  { %1009 = vmatmul.mubr.msk.f32.gmra.mrb[12].mxu0 %vm58_vm0, %v37_v40 }
  0x3d   :  { %1011 = vmatprep.mubr.msk.f32.mxu0 %vm58_vm0, %v38_v41 }
  0x40   :  { %1012 = vmatmul.mubr.msk.f32.gmra.mrb[14].mxu0 %vm58_vm0, %v39_v42 }
  0xf7   :  { %v992_v46 = vpop.f32.mrb[0].mxu0 }
  0xf8   :  { %v366_v47 = vpop.f32.mrb[1].mxu0  ;;  %v446_v49 = vmax.f32 %v992_v46, 0.0 }
  0xf9   :  { %v445_v48 = vmax.f32 %v366_v47, 0.0 }
  0xfb   :  { %v995_v50 = vpop.f32.mrb[2].mxu0  ;;  %1030 = vmatprep.mubr.msk.f32.mxu1 %vm469_vm1, %v445_v48 }
  0xfc   :  { %v376_v51 = vpop.f32.mrb[3].mxu0  ;;  %1031 = vmatmul.mubr.msk.f32.vlgmr.msra.gmra.mrb[0].mxu1 %vm469_vm1, %v446_v49  ;;  %v448_v53 = vmax.f32 %v995_v50, 0.0 }
  0xfd   :  { %v447_v52 = vmax.f32 %v376_v51, 0.0 }
  0xff   :  { %v998_v54 = vpop.f32.mrb[4].mxu0  ;;  %1033 = vmatprep.mubr.msk.f32.mxu1 %vm469_vm1, %v447_v52 }
 0x100   :  { %v386_v55 = vpop.f32.mrb[5].mxu0  ;;  %1034 = vmatmul.mubr.msk.f32.gmra.mrb[2].mxu1 %vm469_vm1, %v448_v53  ;;  %v450_v57 = vmax.f32 %v998_v54, 0.0 }
 0x101   :  { %v449_v56 = vmax.f32 %v386_v55, 0.0 }
 0x103   :  { %v1001_v58 = vpop.f32.mrb[6].mxu0  ;;  %1036 = vmatprep.mubr.msk.f32.mxu1 %vm469_vm1, %v449_v56 }
 0x104   :  { %v396_v59 = vpop.f32.mrb[7].mxu0  ;;  %1037 = vmatmul.mubr.msk.f32.gmra.mrb[4].mxu1 %vm469_vm1, %v450_v57  ;;  %v452_v61 = vmax.f32 %v1001_v58, 0.0  ;;  %v679_v57 = vld [vmem:[%s1441_s5] sm:$0xff] }
 0x105   :  { %v451_v60 = vmax.f32 %v396_v59, 0.0 }
 0x107   :  { %v1004_v62 = vpop.f32.mrb[8].mxu0  ;;  %1039 = vmatprep.mubr.msk.f32.mxu1 %vm469_vm1, %v451_v60 }
 0x108   :  { %v406_v63 = vpop.f32.mrb[9].mxu0  ;;  %1040 = vmatmul.mubr.msk.f32.gmra.mrb[6].mxu1 %vm469_vm1, %v452_v61  ;;  %v454_v1 = vmax.f32 %v1004_v62, 0.0 }
 0x109   :  { %v453_v0 = vmax.f32 %v406_v63, 0.0 }
 0x10b   :  { %v1007_v2 = vpop.f32.mrb[10].mxu0  ;;  %1042 = vmatprep.mubr.msk.f32.mxu1 %vm469_vm1, %v453_v0 }
 0x10c   :  { %v416_v3 = vpop.f32.mrb[11].mxu0  ;;  %1043 = vmatmul.mubr.msk.f32.gmra.mrb[8].mxu1 %vm469_vm1, %v454_v1  ;;  %v456_v5 = vmax.f32 %v1007_v2, 0.0 }
 0x10d   :  { %v455_v4 = vmax.f32 %v416_v3, 0.0 }
 0x10f   :  { %v1010_v6 = vpop.f32.mrb[12].mxu0  ;;  %1045 = vmatprep.mubr.msk.f32.mxu1 %vm469_vm1, %v455_v4 }
 0x110   :  { %v426_v7 = vpop.f32.mrb[13].mxu0  ;;  %1046 = vmatmul.mubr.msk.f32.gmra.mrb[10].mxu1 %vm469_vm1, %v456_v5  ;;  %v458_v9 = vmax.f32 %v1010_v6, 0.0 }
 0x111   :  { %v457_v8 = vmax.f32 %v426_v7, 0.0 }
 0x113   :  { %v1013_v10 = vpop.f32.mrb[14].mxu0  ;;  %1048 = vmatprep.mubr.msk.f32.mxu1 %vm469_vm1, %v457_v8 }
 0x114   :  { %v436_v11 = vpop.f32.mrb[15].mxu0  ;;  %1049 = vmatmul.mubr.msk.f32.gmra.mrb[12].mxu1 %vm469_vm1, %v458_v9  ;;  %v460_v13 = vmax.f32 %v1013_v10, 0.0 }
 0x115   :  { %v459_v12 = vmax.f32 %v436_v11, 0.0 }
 0x117   :  { %1051 = vmatprep.mubr.msk.f32.mxu1 %vm469_vm1, %v459_v12 }
 0x118   :  { %1052 = vmatmul.mubr.msk.f32.gmra.mrb[14].mxu1 %vm469_vm1, %v460_v13 }
 0x119   :  { %1086 = vmatprep.mubr.msk.f32.mxu1 %vm1186_vm2, %v1187_v15 }
 0x1cf   :  { %v1032_v16 = vpop.f32.mrb[0].mxu1 }
 0x1d0   :  { %v664_v17 = vmax.f32 %v1032_v16, 0.0  ;;  %v584_v18 = vpop.f32.mrb[1].mxu1 }
 0x1d1   :  { %v663_v19 = vmax.f32 %v584_v18, 0.0 }
 0x1d3   :  { %v1106_v21 = vpack.c.bf16 %v664_v17, %v663_v19  ;;  %v1035_v22 = vpop.f32.mrb[2].mxu1 }
 0x1d4   :  { %v666_v23 = vmax.f32 %v1035_v22, 0.0  ;;  %v594_v24 = vpop.f32.mrb[3].mxu1 }
 0x1d5   :  { %v665_v25 = vmax.f32 %v594_v24, 0.0  ;;  %1108 = vmatpush3.bf16.xpose.msk.msra.mxu1 %vm1400_vm3, %v1106_v21 }
 0x1d6   :  { %1109 = vmatprep.subr.bf16.mxu1 %v1185_v14 }
 0x1d7   :  { %v1110_v26 = vpack.c.bf16 %v666_v23, %v665_v25  ;;  %v1038_v27 = vpop.f32.mrb[4].mxu1 }
 0x1d8   :  { %v668_v28 = vmax.f32 %v1038_v27, 0.0  ;;  %v604_v29 = vpop.f32.mrb[5].mxu1 }
 0x1d9   :  { %v667_v30 = vmax.f32 %v604_v29, 0.0 }
 0x1db   :  { %v1114_v31 = vpack.c.bf16 %v668_v28, %v667_v30  ;;  %v1041_v32 = vpop.f32.mrb[6].mxu1 }
 0x1dc   :  { %v670_v33 = vmax.f32 %v1041_v32, 0.0  ;;  %v614_v34 = vpop.f32.mrb[7].mxu1 }
 0x1dd   :  { %v669_v35 = vmax.f32 %v614_v34, 0.0  ;;  %1112 = vmatpush3.bf16.xpose.msk.msra.mxu1 %vm1400_vm3, %v1110_v26 }
 0x1de   :  { %1113 = vmatprep.subr.bf16.mxu1 %v1185_v14 }
 0x1df   :  { %v1118_v36 = vpack.c.bf16 %v670_v33, %v669_v35  ;;  %v1044_v37 = vpop.f32.mrb[8].mxu1 }
 0x1e0   :  { %v672_v38 = vmax.f32 %v1044_v37, 0.0  ;;  %v624_v39 = vpop.f32.mrb[9].mxu1 }
 0x1e1   :  { %v671_v40 = vmax.f32 %v624_v39, 0.0 }
 0x1e3   :  { %v1122_v41 = vpack.c.bf16 %v672_v38, %v671_v40  ;;  %v1047_v42 = vpop.f32.mrb[10].mxu1 }
 0x1e4   :  { %v674_v43 = vmax.f32 %v1047_v42, 0.0  ;;  %v634_v44 = vpop.f32.mrb[11].mxu1 }
 0x1e5   :  { %v673_v45 = vmax.f32 %v634_v44, 0.0  ;;  %1116 = vmatpush3.bf16.xpose.msk.msra.mxu1 %vm1400_vm3, %v1114_v31 }
 0x1e6   :  { %1117 = vmatprep.subr.bf16.mxu1 %v1185_v14 }
 0x1e7   :  { %v1126_v46 = vpack.c.bf16 %v674_v43, %v673_v45  ;;  %v1050_v47 = vpop.f32.mrb[12].mxu1 }
 0x1e8   :  { %v676_v48 = vmax.f32 %v1050_v47, 0.0  ;;  %v644_v49 = vpop.f32.mrb[13].mxu1 }
 0x1e9   :  { %v675_v50 = vmax.f32 %v644_v49, 0.0 }
 0x1eb   :  { %v1130_v51 = vpack.c.bf16 %v676_v48, %v675_v50  ;;  %v1053_v52 = vpop.f32.mrb[14].mxu1 }
 0x1ec   :  { %v678_v53 = vmax.f32 %v1053_v52, 0.0  ;;  %v654_v54 = vpop.f32.mrb[15].mxu1 }
 0x1ed   :  { %v677_v55 = vmax.f32 %v654_v54, 0.0  ;;  %1120 = vmatpush3.bf16.xpose.msk.msra.mxu1 %vm1400_vm3, %v1118_v36 }
 0x1ee   :  { %1121 = vmatprep.subr.bf16.mxu1 %v1185_v14 }
 0x1ef   :  { %v1134_v56 = vpack.c.bf16 %v678_v53, %v677_v55 }
 0x1f5   :  { %1124 = vmatpush3.bf16.xpose.msk.msra.mxu1 %vm1400_vm3, %v1122_v41 }
 0x1f6   :  { %1125 = vmatprep.subr.bf16.mxu1 %v1185_v14 }
 0x1fd   :  { %1128 = vmatpush3.bf16.xpose.msk.msra.mxu1 %vm1400_vm3, %v1126_v46 }
 0x1fe   :  { %1129 = vmatprep.subr.bf16.mxu1 %v1185_v14 }
 0x205   :  { %1132 = vmatpush3.bf16.xpose.msk.msra.mxu1 %vm1400_vm3, %v1130_v51 }
 0x206   :  { %1133 = vmatprep.subr.bf16.mxu1 %v1185_v14 }
 0x20d   :  { %1136 = vmatpush3.bf16.xpose.msk.msra.mxu1 %vm1400_vm3, %v1134_v56 }
 0x214   :  { %1087 = vmatmul.mubr.msk.f32.vlgmr.msra.gmra.mrb[16].mxu1 %vm469_vm1, %v679_v57 }
 0x2e7   :  { %v797_v58 = vpop.f32.mrb[16].mxu1 }
 0x2e8   :  { %v801_v59 = vsub.f32 0.0, %v797_v58  ;;  %v1088_v60 = vpop.f32.mrb[17].mxu1 }
 0x2ea   :  { %v802_v61 = vmul.f32 1.442695, %v801_v59 }
 0x2ec   :  { %1157 = vpow2.f32 %v802_v61 }
 0x2f6   :  { %v1158_v62 = vpop.eup %1157 }
 0x2f7   :  { %v804_v63 = vadd.f32 1.0, %v1158_v62 }
 0x2f9   :  { %1159 = vrcp.f32 %v804_v63 }
 0x303   :  { %v1160_v0 = vpop.eup %1159 }
 0x304   :  { %807 = vst [vmem:[#allocation2] sm:$0x7] %v1160_v0 }
 0x305   :  { %1172 = shalt.err (!%p1169_p4)
}
 0x306   :  { %s1173_s29 = scalar_lea.hbm %s1442_s6, 64 }
 0x307   :  { %p1174_p5 = scmp.ne.s32.totalorder %s1442_s6, %s1173_s29  ;;  %p1177_p6 = scmp.lt.u32.totalorder %s1173_s29, %s1442_s6 }
 0x309   :  { %p1179_p7 = pnand %p1177_p6, %p1174_p5 }
 0x30b   :  { %1182 = shalt.err (!%p1179_p7)
}
 0x30c   :  { %817 = dma.vmem_to_hbm [thread:$0]  %s815_s26, 64, %s1442_s6, [#allocation3]  }
 0x30d   :  { %1183 = dma.done.wait [#allocation3], 64  }
 0x30e   :  { %1184 = vsyncadd [#allocation3], 4294967232 }
 0x30f   :  { %821 = vsyncpa [#allocation3], 1 }

</bundles_post_ra>
